<compile_context>
chip_gen: v6e
topology: v6e:2x2x1
jax: 0.10.0
libtpu: 0.0.40
codegen_flags: <defaults>
</compile_context>

<pallas_src>
import functools

import jax
import jax.numpy as jnp
from jax.experimental import pallas as pl
from jax.experimental.pallas import tpu as pltpu


def _focal_loss_kernel(*refs, gamma, ignore_index, n_rows, tile_rows,
                       tiles_per_par, has_weights):
    if has_weights:
        logits_ref, targets_ref, weights_ref, sum_ref, cnt_ref = refs
    else:
        logits_ref, targets_ref, sum_ref, cnt_ref = refs
        weights_ref = None

    p = pl.program_id(0)   # parallel slice (TensorCore on v7x)
    j = pl.program_id(1)   # row-tile index within the slice (reduction axis)

    @pl.when(j == 0)
    def _():
        sum_ref[...] = jnp.zeros_like(sum_ref)
        cnt_ref[...] = jnp.zeros_like(cnt_ref)

    x = logits_ref[...].astype(jnp.float32)      # (TM, V), cast in-kernel
    t = targets_ref[...]                         # (TM, 1) int32

    # Global (unclamped) row ids of this tile; rows >= N are masked out.
    tile_idx = p * tiles_per_par + j
    row = tile_idx * tile_rows + jax.lax.broadcasted_iota(
        jnp.int32, (tile_rows, 1), 0)
    in_bounds = row < n_rows                     # (TM, 1) bool

    # one-hot of the target id over the vocab (lane) axis
    col = jax.lax.broadcasted_iota(jnp.int32, x.shape, 1)   # (TM, V)
    onehot = col == t                                        # (TM, V)

    # stable log-sum-exp over V
    m = jnp.max(x, axis=-1, keepdims=True)                   # (TM, 1)
    lse = m + jnp.log(jnp.sum(jnp.exp(x - m), axis=-1, keepdims=True))

    # gather target logit (and per-class weight) via masked reductions
    tgt_logit = jnp.sum(jnp.where(onehot, x, 0.0), axis=-1, keepdims=True)

    if has_weights:
        w = weights_ref[...].astype(jnp.float32)             # (1, V)
        w_t = jnp.sum(jnp.where(onehot, w, 0.0), axis=-1, keepdims=True)
        ce = w_t * (lse - tgt_logit)                          # (TM, 1)
    else:
        ce = lse - tgt_logit

    valid = jnp.logical_and(t != ignore_index, in_bounds)     # (TM, 1) bool

    # focal modulation, specialized on gamma at trace time
    if gamma == 0.0:
        focal = ce
    else:
        pt = jnp.exp(-ce)
        one_minus_pt = 1.0 - pt
        if float(gamma).is_integer() and 1 <= int(gamma) <= 4:
            mod = one_minus_pt
            for _ in range(int(gamma) - 1):
                mod = mod * one_minus_pt
        else:
            mod = jnp.power(one_minus_pt, gamma)
        focal = mod * ce

    # Mask AFTER focal is fully formed so garbage rows (boundary tiles) never
    # contaminate the sums even if they produced inf/NaN intermediates.
    focal = jnp.where(valid, focal, 0.0)

    sum_ref[...] += jnp.sum(focal).reshape(sum_ref.shape)
    cnt_ref[...] += jnp.sum(valid.astype(jnp.float32)).reshape(cnt_ref.shape)


def focal_loss(inputs, targets, class_weights=None, *,
               gamma=0.0, ignore_index=0, tile_rows=None,
               tile_budget_bytes=2 * 1024 * 1024):
    """inputs: (B, T, V) float logits (any float dtype); targets: (B, T) ints."""
    B, T, V = inputs.shape
    N = B * T

    logits_2d = inputs.reshape(N, V)                   # native dtype, no host cast
    targets_2d = targets.reshape(N, 1).astype(jnp.int32)

    itemsize = jnp.dtype(logits_2d.dtype).itemsize

    # Row tile: largest multiple of 8 whose per-buffer (native dtype) logits
    # tile fits the budget; capped, and never larger than the (rounded) row count.
    if tile_rows is None:
        tm = tile_budget_bytes // max(1, V * itemsize)
        tm = max(8, (tm // 8) * 8)
        tm = min(tm, 256)
    else:
        tm = max(8, (int(tile_rows) // 8) * 8)
    tm = min(tm, max(8, ((N + 7) // 8) * 8))

    n_tiles = pl.cdiv(N, tm)
    n_par = 2 if n_tiles >= 2 else 1        # v7x: split row loop across 2 TCs
    tiles_per_par = pl.cdiv(n_tiles, n_par)

    # Clamp the block index so the (possibly) one extra tile of the parallel
    # split never DMAs fully out of bounds; its rows are masked in-kernel.
    def tile_map(p, j):
        return (jnp.minimum(p * tiles_per_par + j, n_tiles - 1), 0)

    has_weights = class_weights is not None
    operands = [logits_2d, targets_2d]
    in_specs = [
        pl.BlockSpec((tm, V), tile_map),   # logits tile (native dtype)
        pl.BlockSpec((tm, 1), tile_map),   # targets tile
    ]
    if has_weights:
        operands.append(class_weights.reshape(1, V).astype(jnp.float32))
        in_specs.append(pl.BlockSpec((1, V), lambda p, j: (0, 0)))  # resident

    kernel = functools.partial(
        _focal_loss_kernel,
        gamma=float(gamma),
        ignore_index=int(ignore_index),
        n_rows=N,
        tile_rows=tm,
        tiles_per_par=tiles_per_par,
        has_weights=has_weights)

    sum_out, cnt_out = pl.pallas_call(
        kernel,
        out_shape=(jax.ShapeDtypeStruct((n_par, 1, 1), jnp.float32),
                   jax.ShapeDtypeStruct((n_par, 1, 1), jnp.float32)),
        grid_spec=pltpu.PrefetchScalarGridSpec(
            num_scalar_prefetch=0,
            grid=(n_par, tiles_per_par),
            in_specs=in_specs,
            out_specs=[
                pl.BlockSpec((1, 1, 1), lambda p, j: (p, 0, 0)),  # per-slice sum
                pl.BlockSpec((1, 1, 1), lambda p, j: (p, 0, 0)),  # per-slice count
            ],
        ),
        compiler_params=pltpu.CompilerParams(
            dimension_semantics=("parallel", "arbitrary"),
            vmem_limit_bytes=40 * 1024 * 1024),
    )(*operands)

    total = jnp.sum(sum_out)
    count = jnp.sum(cnt_out)
    return jnp.where(count > 0, total / jnp.maximum(count, 1.0),
                     jnp.float32(0.0))


def focal_loss_reference(inputs, targets, class_weights=None, *,
                         gamma=0.0, ignore_index=0):
    """Pure-JAX reference mirroring torch.nn.functional.cross_entropy semantics."""
    B, T, V = inputs.shape
    x = inputs.reshape(-1, V).astype(jnp.float32)
    t = targets.reshape(-1).astype(jnp.int32)
    logp = jax.nn.log_softmax(x, axis=-1)
    tgt_logp = jnp.take_along_axis(logp, t[:, None], axis=-1)[:, 0]
    if class_weights is None:
        w_t = jnp.ones_like(tgt_logp)
    else:
        w_t = class_weights.astype(jnp.float32)[t]
    ce = -w_t * tgt_logp
    valid = t != ignore_index
    pt = jnp.exp(-ce)
    focal = jnp.power(1.0 - pt, gamma) * ce
    focal = jnp.where(valid, focal, 0.0)
    cnt = jnp.sum(valid.astype(jnp.float32))
    return jnp.where(cnt > 0, jnp.sum(focal) / jnp.maximum(cnt, 1.0),
                     jnp.float32(0.0))


if __name__ == "__main__":
    key = jax.random.PRNGKey(0)

    # --- Test 1: weighted, gamma=2, ignore_index present, single tile ---
    B, T, V = 2, 8, 32
    gamma = 2.0
    ignore_index = 0

    k1, k2 = jax.random.split(key)
    inputs = jax.random.normal(k1, (B, T, V), dtype=jnp.float32)
    targets = jax.random.randint(k2, (B, T), 0, V, dtype=jnp.int32)
    class_weights = 0.5 + jnp.arange(V, dtype=jnp.float32) / V

    out = focal_loss(inputs, targets, class_weights,
                     gamma=gamma, ignore_index=ignore_index)
    out = jax.block_until_ready(out)
    ref = focal_loss_reference(inputs, targets, class_weights,
                               gamma=gamma, ignore_index=ignore_index)
    assert jnp.allclose(out, ref, rtol=1e-5, atol=1e-5), (out, ref)

    # --- Test 2: no weights, gamma=0, N not a multiple of the tile, bf16 input,
    # parallel axis of 2 with a partial boundary tile (exercises row masking) ---
    B2, T2 = 3, 5
    k3, k4 = jax.random.split(k2)
    inputs2 = jax.random.normal(k3, (B2, T2, V), dtype=jnp.float32).astype(jnp.bfloat16)
    targets2 = jax.random.randint(k4, (B2, T2), 0, V, dtype=jnp.int32)

    out2 = focal_loss(inputs2, targets2, None,
                      gamma=0.0, ignore_index=ignore_index, tile_rows=8)
    out2 = jax.block_until_ready(out2)
    ref2 = focal_loss_reference(inputs2.astype(jnp.float32), targets2, None,
                                gamma=0.0, ignore_index=ignore_index)
    assert jnp.allclose(out2, ref2, rtol=2e-2, atol=2e-2), (out2, ref2)

    print("KERNEL_OK")
</pallas_src>

<mosaic_0001>
module attributes {stable_mosaic.version = 11 : i64} {
  func.func @_focal_loss_kernel(%arg0: i32, %arg1: i32, %arg2: memref<16x32xf32, #tpu.memory_space<vmem>>, %arg3: memref<16x1xi32, #tpu.memory_space<vmem>>, %arg4: memref<1x32xf32, #tpu.memory_space<vmem>>, %arg5: memref<1x1x1xf32, #tpu.memory_space<vmem>>, %arg6: memref<1x1x1xf32, #tpu.memory_space<vmem>>) attributes {dimension_semantics = [#tpu.dimension_semantics<parallel>, #tpu.dimension_semantics<arbitrary>], iteration_bounds = array<i64: 1, 1>, scalar_prefetch = 0 : i64, scratch_operands = 0 : i64, tpu.core_type = #tpu.core_type<tc>, window_params = [{transform_indices = @transform_0, window_bounds = array<i64: 16, 32>}, {transform_indices = @transform_1, window_bounds = array<i64: 16, 1>}, {pipeline_mode = #tpu.pipeline_mode<synchronous>, transform_indices = @transform_2, window_bounds = array<i64: 1, 32>}, {transform_indices = @transform_3, window_bounds = array<i64: 1, 1, 1>}, {transform_indices = @transform_4, window_bounds = array<i64: 1, 1, 1>}]} {
    %c0_i32 = arith.constant 0 : i32
    %0 = arith.cmpi eq, %arg1, %c0_i32 : i32
    %1 = arith.extui %0 : i1 to i32
    %c0_i32_0 = arith.constant 0 : i32
    %2 = arith.cmpi ne, %1, %c0_i32_0 : i32
    scf.if %2 {
      %cst_30 = arith.constant 0.000000e+00 : f32
      %68 = vector.broadcast %cst_30 : f32 to vector<1x1x1xf32>
      %c0_31 = arith.constant 0 : index
      %c0_32 = arith.constant 0 : index
      %c0_33 = arith.constant 0 : index
      %69 = vector.load %arg5[%c0_31, %c0_32, %c0_33] : memref<1x1x1xf32, #tpu.memory_space<vmem>>, vector<1x1x1xf32>
      tpu.vector_store %arg5[%c0_31, %c0_32, %c0_33], %68 {strides = array<i32>} : memref<1x1x1xf32, #tpu.memory_space<vmem>>, vector<1x1x1xf32>,
      %cst_34 = arith.constant 0.000000e+00 : f32
      %70 = vector.broadcast %cst_34 : f32 to vector<1x1x1xf32>
      %c0_35 = arith.constant 0 : index
      %c0_36 = arith.constant 0 : index
      %c0_37 = arith.constant 0 : index
      %71 = vector.load %arg6[%c0_35, %c0_36, %c0_37] : memref<1x1x1xf32, #tpu.memory_space<vmem>>, vector<1x1x1xf32>
      tpu.vector_store %arg6[%c0_35, %c0_36, %c0_37], %70 {strides = array<i32>} : memref<1x1x1xf32, #tpu.memory_space<vmem>>, vector<1x1x1xf32>,
    } else {
    }
    %c0 = arith.constant 0 : index
    %c0_1 = arith.constant 0 : index
    %3 = vector.load %arg2[%c0, %c0_1] : memref<16x32xf32, #tpu.memory_space<vmem>>, vector<16x32xf32>
    %c0_2 = arith.constant 0 : index
    %c0_3 = arith.constant 0 : index
    %4 = vector.load %arg3[%c0_2, %c0_3] : memref<16x1xi32, #tpu.memory_space<vmem>>, vector<16x1xi32>
    %c1_i32 = arith.constant 1 : i32
    %5 = arith.muli %arg0, %c1_i32 : i32
    %6 = arith.addi %5, %arg1 : i32
    %c16_i32 = arith.constant 16 : i32
    %7 = arith.muli %6, %c16_i32 : i32
    %8 = tpu.iota {dimensions = array<i32: 0>} : vector<16x1xi32>
    %9 = vector.broadcast %7 : i32 to vector<16x1xi32>
    %10 = arith.addi %9, %8 : vector<16x1xi32>
    %c16_i32_4 = arith.constant 16 : i32
    %11 = vector.broadcast %c16_i32_4 : i32 to vector<16x1xi32>
    %12 = arith.cmpi slt, %10, %11 : vector<16x1xi32>
    %13 = tpu.iota {dimensions = array<i32: 1>} : vector<16x32xi32>
    %14 = vector.broadcast %4 : vector<16x1xi32> to vector<16x32xi32>
    %15 = arith.cmpi eq, %13, %14 : vector<16x32xi32>
    %cst = arith.constant dense<0xFF800000> : vector<16xf32>
    %16 = vector.multi_reduction <maximumf>, %3, %cst [1] : vector<16x32xf32> to vector<16xf32>
    %17 = vector.shape_cast %16 : vector<16xf32> to vector<16x1xf32>
    %18 = vector.broadcast %17 : vector<16x1xf32> to vector<16x32xf32>
    %19 = arith.subf %3, %18 : vector<16x32xf32>
    %20 = math.exp %19 : vector<16x32xf32>
    %cst_5 = arith.constant dense<0.000000e+00> : vector<16xf32>
    %21 = vector.multi_reduction <add>, %20, %cst_5 [1] : vector<16x32xf32> to vector<16xf32>
    %22 = vector.shape_cast %21 : vector<16xf32> to vector<16x1xf32>
    %23 = math.log %22 : vector<16x1xf32>
    %24 = arith.addf %17, %23 : vector<16x1xf32>
    %cst_6 = arith.constant 0.000000e+00 : f32
    %25 = vector.broadcast %cst_6 : f32 to vector<16x32xf32>
    %26 = arith.select %15, %3, %25 : vector<16x32xi1>, vector<16x32xf32>
    %cst_7 = arith.constant dense<0.000000e+00> : vector<16xf32>
    %27 = vector.multi_reduction <add>, %26, %cst_7 [1] : vector<16x32xf32> to vector<16xf32>
    %28 = vector.shape_cast %27 : vector<16xf32> to vector<16x1xf32>
    %c0_8 = arith.constant 0 : index
    %c0_9 = arith.constant 0 : index
    %29 = vector.load %arg4[%c0_8, %c0_9] : memref<1x32xf32, #tpu.memory_space<vmem>>, vector<1x32xf32>
    %cst_10 = arith.constant 0.000000e+00 : f32
    %30 = vector.shape_cast %29 : vector<1x32xf32> to vector<1x32xf32>
    %31 = vector.broadcast %30 : vector<1x32xf32> to vector<16x32xf32>
    %32 = vector.broadcast %cst_10 : f32 to vector<16x32xf32>
    %33 = arith.select %15, %31, %32 : vector<16x32xi1>, vector<16x32xf32>
    %cst_11 = arith.constant dense<0.000000e+00> : vector<16xf32>
    %34 = vector.multi_reduction <add>, %33, %cst_11 [1] : vector<16x32xf32> to vector<16xf32>
    %35 = vector.shape_cast %34 : vector<16xf32> to vector<16x1xf32>
    %36 = arith.subf %24, %28 : vector<16x1xf32>
    %37 = arith.mulf %35, %36 : vector<16x1xf32>
    %c0_i32_12 = arith.constant 0 : i32
    %38 = vector.broadcast %c0_i32_12 : i32 to vector<16x1xi32>
    %39 = arith.cmpi ne, %4, %38 : vector<16x1xi32>
    %40 = arith.andi %39, %12 : vector<16x1xi1>
    %cst_13 = arith.constant 0.000000e+00 : f32
    %41 = vector.broadcast %cst_13 : f32 to vector<16x1xf32>
    %42 = arith.subf %41, %37 : vector<16x1xf32>
    %43 = math.exp %42 : vector<16x1xf32>
    %cst_14 = arith.constant 1.000000e+00 : f32
    %44 = vector.broadcast %cst_14 : f32 to vector<16x1xf32>
    %45 = arith.subf %44, %43 : vector<16x1xf32>
    %46 = arith.mulf %45, %45 : vector<16x1xf32>
    %47 = arith.mulf %46, %37 : vector<16x1xf32>
    %cst_15 = arith.constant 0.000000e+00 : f32
    %48 = vector.broadcast %cst_15 : f32 to vector<16x1xf32>
    %49 = arith.select %40, %47, %48 : vector<16x1xi1>, vector<16x1xf32>
    %c0_16 = arith.constant 0 : index
    %c0_17 = arith.constant 0 : index
    %c0_18 = arith.constant 0 : index
    %50 = vector.load %arg5[%c0_16, %c0_17, %c0_18] : memref<1x1x1xf32, #tpu.memory_space<vmem>>, vector<1x1x1xf32>
    %51 = vector.shape_cast %49 : vector<16x1xf32> to vector<1x16x1xf32>
    %cst_19 = arith.constant dense<0.000000e+00> : vector<1xf32>
    %52 = vector.multi_reduction <add>, %51, %cst_19 [1, 2] : vector<1x16x1xf32> to vector<1xf32>
    %53 = vector.shape_cast %52 : vector<1xf32> to vector<1x1x1xf32>
    %54 = vector.extract %53[0, 0, 0] : f32 from vector<1x1x1xf32>
    %55 = vector.broadcast %54 : f32 to vector<1x1x1xf32>
    %56 = arith.addf %50, %55 : vector<1x1x1xf32>
    %c0_20 = arith.constant 0 : index
    %c0_21 = arith.constant 0 : index
    %c0_22 = arith.constant 0 : index
    %57 = vector.load %arg5[%c0_20, %c0_21, %c0_22] : memref<1x1x1xf32, #tpu.memory_space<vmem>>, vector<1x1x1xf32>
    tpu.vector_store %arg5[%c0_20, %c0_21, %c0_22], %56 {strides = array<i32>} : memref<1x1x1xf32, #tpu.memory_space<vmem>>, vector<1x1x1xf32>,
    %c0_23 = arith.constant 0 : index
    %c0_24 = arith.constant 0 : index
    %c0_25 = arith.constant 0 : index
    %58 = vector.load %arg6[%c0_23, %c0_24, %c0_25] : memref<1x1x1xf32, #tpu.memory_space<vmem>>, vector<1x1x1xf32>
    %59 = arith.extui %40 : vector<16x1xi1> to vector<16x1xi32>
    %60 = arith.sitofp %59 : vector<16x1xi32> to vector<16x1xf32>
    %61 = vector.shape_cast %60 : vector<16x1xf32> to vector<1x16x1xf32>
    %cst_26 = arith.constant dense<0.000000e+00> : vector<1xf32>
    %62 = vector.multi_reduction <add>, %61, %cst_26 [1, 2] : vector<1x16x1xf32> to vector<1xf32>
    %63 = vector.shape_cast %62 : vector<1xf32> to vector<1x1x1xf32>
    %64 = vector.extract %63[0, 0, 0] : f32 from vector<1x1x1xf32>
    %65 = vector.broadcast %64 : f32 to vector<1x1x1xf32>
    %66 = arith.addf %58, %65 : vector<1x1x1xf32>
    %c0_27 = arith.constant 0 : index
    %c0_28 = arith.constant 0 : index
    %c0_29 = arith.constant 0 : index
    %67 = vector.load %arg6[%c0_27, %c0_28, %c0_29] : memref<1x1x1xf32, #tpu.memory_space<vmem>>, vector<1x1x1xf32>
    tpu.vector_store %arg6[%c0_27, %c0_28, %c0_29], %66 {strides = array<i32>} : memref<1x1x1xf32, #tpu.memory_space<vmem>>, vector<1x1x1xf32>,
    return
  }
  func.func @transform_0(%arg0: i32, %arg1: i32) -> (i32, i32) {
    %c1_i32 = arith.constant 1 : i32
    %0 = arith.muli %arg0, %c1_i32 : i32
    %1 = arith.addi %0, %arg1 : i32
    %c0_i32 = arith.constant 0 : i32
    %2 = arith.minsi %1, %c0_i32 : i32
    %c0_i32_0 = arith.constant 0 : i32
    %c0_i32_1 = arith.constant 0 : i32
    return %2, %c0_i32_0 : i32, i32
  }
  func.func @transform_1(%arg0: i32, %arg1: i32) -> (i32, i32) {
    %c1_i32 = arith.constant 1 : i32
    %0 = arith.muli %arg0, %c1_i32 : i32
    %1 = arith.addi %0, %arg1 : i32
    %c0_i32 = arith.constant 0 : i32
    %2 = arith.minsi %1, %c0_i32 : i32
    %c0_i32_0 = arith.constant 0 : i32
    %c0_i32_1 = arith.constant 0 : i32
    return %2, %c0_i32_0 : i32, i32
  }
  func.func @transform_2(%arg0: i32, %arg1: i32) -> (i32, i32) {
    %c0_i32 = arith.constant 0 : i32
    %c0_i32_0 = arith.constant 0 : i32
    %c0_i32_1 = arith.constant 0 : i32
    return %c0_i32, %c0_i32_0 : i32, i32
  }
  func.func @transform_3(%arg0: i32, %arg1: i32) -> (i32, i32, i32) {
    %c0_i32 = arith.constant 0 : i32
    %c0_i32_0 = arith.constant 0 : i32
    %c0_i32_1 = arith.constant 0 : i32
    return %arg0, %c0_i32, %c0_i32_0 : i32, i32, i32
  }
  func.func @transform_4(%arg0: i32, %arg1: i32) -> (i32, i32, i32) {
    %c0_i32 = arith.constant 0 : i32
    %c0_i32_0 = arith.constant 0 : i32
    %c0_i32_1 = arith.constant 0 : i32
    return %arg0, %c0_i32, %c0_i32_0 : i32, i32, i32
  }
}

</mosaic_0001>

<bundles_post_ra>
// kernel: tpu_custom_call.1
= control target key start
LH: loop header
LB: loop body
LE: loop exit
PB: predicated region body
PF: predicated region fallthrough
CT: control target
= control target key end

     0   :  { %10 = vsyncpa [#allocation3], 0  ;;  %vm113_vm0 = vcmask 261120   ;;  %v330_v4 = vmov 0   ;;  %s412_s0 = inlined_call_operand.vmem [shape: f32[16,32], index: 0, kind: input, shape index: {}]   ;;  %s413_s1 = inlined_call_operand.vmem [shape: s32[16,1], index: 1, kind: input, shape index: {}]   ;;  %s414_s2 = inlined_call_operand.vmem [shape: f32[1,32], index: 2, kind: input, shape index: {}]   ;;  %s415_s3 = inlined_call_operand.hbm [shape: f32[1,1,1], index: 3, kind: output, shape index: {0}]   ;;  %s416_s4 = inlined_call_operand.hbm [shape: f32[1,1,1], index: 4, kind: output, shape index: {1}]  }
   0x1   :  { %v89_v0 = vld [vmem:[%s412_s0] sm:$0xff]  ;;  %v90_v1 = vld [vmem:[%s412_s0 + $0x8] sm:$0xff]  ;;  %272 = vset.pattern.permute.xlu1 %v330_v4  ;;  %273 = vset.pattern.permute.xlu0 %v330_v4 }
   0x2   :  { %v368_v2 = vld [vmem:[%s413_s1] sm:$0xff]  ;;  %v114_v3 = vsel %vm113_vm0, %v89_v0, -inf }
   0x3   :  { %11 = vsyncpa [#allocation5], 0  ;;  %115 = vmax.xlane.f32.xlu0 %v114_v3  ;;  %106 = vperm.xlu1 %272, %v368_v2   ;;  %v117_v5 = vsel %vm113_vm0, %v90_v1, -inf  ;;  %v376_v6 = vld [vmem:[%s413_s1 + $0x8] sm:$0xff]  ;;  %v103_v13 = vlaneseq  ;;  %v261_v24 = vld [vmem:[%s414_s2] ss:$0 sm:$0xff] }
   0x4   :  { %vm165_vm3 = vcmp.ne.s32.totalorder %v368_v2, 0  ;;  %v331_v30 = vmov 0.0   ;;  %vm166_vm4 = vcmp.ne.s32.totalorder %v376_v6, 0  ;;  %vm184_vm5 = vcmask 7168   ;;  %s332_s2 = smov [#allocation2]   ;;  %s333_s25 = smov [#allocation4]  }
   0x5   :  { %v104_v15 = vand.u32 127, %v103_v13  ;;  %v262_v31 = vsel %vm165_vm3, 1.0, %v331_v30  ;;  %v263_v32 = vsel %vm166_vm4, 1.0, %v331_v30  ;;  %vm86_vm6 = vcmask 0   ;;  %s227_s23 = sshll.u32 %s332_s2, 4  ;;  %s237_s26 = sshll.u32 %s333_s25, 4  ;;  %s228_s23 = int_to_ptr.vmem [resolvable:$true] %s227_s23  ;;  %s238_s26 = int_to_ptr.vmem [resolvable:$true] %s237_s26 }
   0x6   :  { %v206_v33 = vsel %vm184_vm5, %v262_v31, 0.0  ;;  %v207_v34 = vsel %vm184_vm5, %v263_v32, 0.0  ;;  %87 = vst.msk [vmem:[#allocation2] sm:$0x1] %vm86_vm6, %v331_v30  ;;  %88 = vst.msk [vmem:[#allocation4] sm:$0x1] %vm86_vm6, %v331_v30  ;;  %p291_p1 = scmp.lt.s32.totalorder %s228_s23, %s228_s23 }
   0x7   :  { %118 = vmax.xlane.f32.xlu0 %v117_v5  ;;  %109 = vperm.xlu1 %272, %v376_v6   ;;  %v208_v35 = vadd.f32 %v207_v34, %v206_v33  ;;  %s286_s28 = scalar_lea.vmem %s228_s23, 16  ;;  %s290_s29 = scalar_lea.vmem %s228_s23, 32 }
   0x8   :  { %p287_p0 = scmp.ne.s32.totalorder %s228_s23, %s286_s28  ;;  %p292_p2 = scmp.lt.s32.totalorder %s290_s29, %s286_s28 }
   0xa   :  { %p293_p3 = por %p292_p2, %p291_p1 }
   0xc   :  { %p294_p4 = pnand %p293_p3, %p287_p0 }
  0x7e   :  { %v107_v14 = vpop.permute.xlu1 %106 }
  0x7f   :  { %vm111_vm1 = vcmp.eq.s32.totalorder %v104_v15, %v107_v14 }
  0x80   :  { %v138_v18 = vsel %vm111_vm1, %v89_v0, 0.0  ;;  %v153_v26 = vsel %vm111_vm1, %v261_v24, 0.0 }
  0x81   :  { %v140_v20 = vsel %vm113_vm0, %v138_v18, 0.0  ;;  %v155_v27 = vsel %vm113_vm0, %v153_v26, 0.0 }
  0x82   :  { %v110_v16 = vpop.permute.xlu1 %109 }
  0x83   :  { %vm112_vm2 = vcmp.eq.s32.totalorder %v104_v15, %v110_v16 }
  0x84   :  { %v139_v22 = vsel %vm112_vm2, %v90_v1, 0.0  ;;  %v154_v28 = vsel %vm112_vm2, %v261_v24, 0.0 }
  0x85   :  { %v143_v25 = vsel %vm113_vm0, %v139_v22, 0.0  ;;  %v158_v29 = vsel %vm113_vm0, %v154_v28, 0.0  ;;  %v201_v22 = vld [vmem:[#allocation4] sm:$0x1] }
  0x8c   :  { %v116_v7 = vpop.xlane.xlu0 %115 }
  0x8d   :  { %v120_v8 = vsub.f32 %v89_v0, %v116_v7 }
  0x8f   :  { %v122_v9 = vmul.f32 1.442695, %v120_v8 }
  0x90   :  { %v119_v10 = vpop.xlane.xlu0 %118 }
  0x91   :  { %274 = vpow2.f32 %v122_v9  ;;  %v121_v11 = vsub.f32 %v90_v1, %v119_v10 }
  0x93   :  { %v124_v12 = vmul.f32 1.442695, %v121_v11 }
  0x95   :  { %276 = vpow2.f32 %v124_v12 }
  0x9e   :  { %v275_v17 = vpop.eup %274 }
  0x9f   :  { %v126_v19 = vsel %vm113_vm0, %v275_v17, 0.0 }
  0xa0   :  { %127 = vadd.xlane.f32.xlu0 %v126_v19  ;;  %v183_v19 = vld [vmem:[#allocation2] sm:$0x1] }
  0xa2   :  { %v277_v21 = vpop.eup %276 }
  0xa3   :  { %v129_v23 = vsel %vm113_vm0, %v277_v21, 0.0 }
  0xa4   :  { %141 = vadd.xlane.f32.xlu0 %v140_v20  ;;  %130 = vadd.xlane.f32.xlu1 %v129_v23 }
  0xa8   :  { %144 = vadd.xlane.f32.xlu0 %v143_v25 }
  0xac   :  { %156 = vadd.xlane.f32.xlu0 %v155_v27 }
  0xb0   :  { %159 = vadd.xlane.f32.xlu0 %v158_v29 }
 0x129   :  { %v128_v36 = vpop.xlane.xlu0 %127 }
 0x12a   :  { %278 = vlog2.f32 %v128_v36 }
 0x12d   :  { %v131_v37 = vpop.xlane.xlu1 %130  ;;  %v142_v38 = vpop.xlane.xlu0 %141 }
 0x12e   :  { %280 = vlog2.f32 %v131_v37 }
 0x131   :  { %v145_v39 = vpop.xlane.xlu0 %144 }
 0x135   :  { %v157_v44 = vpop.xlane.xlu0 %156 }
 0x137   :  { %v279_v40 = vpop.eup %278 }
 0x138   :  { %v133_v41 = vmul.f32 0.6931472, %v279_v40 }
 0x139   :  { %v160_v51 = vpop.xlane.xlu0 %159 }
 0x13a   :  { %v136_v42 = vadd.f32 %v133_v41, %v116_v7 }
 0x13b   :  { %v281_v43 = vpop.eup %280 }
 0x13c   :  { %v135_v45 = vmul.f32 0.6931472, %v281_v43  ;;  %v161_v46 = vsub.f32 %v136_v42, %v142_v38 }
 0x13e   :  { %v137_v47 = vadd.f32 %v135_v45, %v119_v10  ;;  %v163_v48 = vmul.f32 %v161_v46, %v157_v44 }
 0x140   :  { %v162_v49 = vsub.f32 %v137_v47, %v145_v39  ;;  %v169_v50 = vsub.f32 0.0, %v163_v48 }
 0x142   :  { %v171_v52 = vmul.f32 1.442695, %v169_v50  ;;  %v164_v53 = vmul.f32 %v162_v49, %v160_v51 }
 0x144   :  { %282 = vpow2.f32 %v171_v52  ;;  %v170_v54 = vsub.f32 0.0, %v164_v53 }
 0x146   :  { %v173_v55 = vmul.f32 1.442695, %v170_v54 }
 0x148   :  { %284 = vpow2.f32 %v173_v55 }
 0x151   :  { %v283_v56 = vpop.eup %282 }
 0x152   :  { %v175_v57 = vsub.f32 1.0, %v283_v56 }
 0x154   :  { %v177_v58 = vmul.f32 %v175_v57, %v175_v57 }
 0x155   :  { %v285_v59 = vpop.eup %284 }
 0x156   :  { %v179_v60 = vmul.f32 %v177_v58, %v163_v48  ;;  %v176_v61 = vsub.f32 1.0, %v285_v59 }
 0x158   :  { %v178_v62 = vmul.f32 %v176_v61, %v176_v61  ;;  %v181_v0 = vsel %vm165_vm3, %v179_v60, 0.0 }
 0x159   :  { %v185_v3 = vsel %vm184_vm5, %v181_v0, 0.0 }
 0x15a   :  { %v180_v63 = vmul.f32 %v178_v62, %v164_v53 }
 0x15c   :  { %v182_v1 = vsel %vm166_vm4, %v180_v63, 0.0 }
 0x15d   :  { %v186_v4 = vsel %vm184_vm5, %v182_v1, 0.0 }
 0x15e   :  { %v187_v5 = vadd.f32 %v186_v4, %v185_v3 }
 0x160   :  { %188 = vadd.xlane.f32.xlu0 %v187_v5 }
 0x164   :  { %209 = vadd.xlane.f32.xlu0 %v208_v35 }
 0x1e9   :  { %v189_v7 = vpop.xlane.xlu0 %188 }
 0x1ea   :  { %v190_v8 = vrot.slane %v189_v7, 4 }
 0x1ec   :  { %v191_v9 = vadd.f32 %v190_v8, %v189_v7 }
 0x1ed   :  { %v210_v2 = vpop.xlane.xlu0 %209 }
 0x1ee   :  { %v192_v10 = vrot.slane %v191_v9, 2  ;;  %v211_v11 = vrot.slane %v210_v2, 4 }
 0x1f0   :  { %v212_v6 = vadd.f32 %v211_v11, %v210_v2  ;;  %v193_v12 = vadd.f32 %v192_v10, %v191_v9 }
 0x1f2   :  { %v213_v13 = vrot.slane %v212_v6, 2  ;;  %v194_v14 = vrot.slane %v193_v12, 1 }
 0x1f4   :  { %v214_v15 = vadd.f32 %v213_v13, %v212_v6  ;;  %v195_v16 = vadd.f32 %v194_v14, %v193_v12 }
 0x1f6   :  { %264 = vpush %v195_v16  ;;  %v215_v17 = vrot.slane %v214_v15, 1 }
 0x1f8   :  { %v216_v18 = vadd.f32 %v215_v17, %v214_v15 }
 0x1fa   :  { %266 = vpush %v216_v18 }
 0x227   :  { %s265_s24 = spop %264 }
 0x228   :  { %v197_v20 = vstv %s265_s24 }
 0x229   :  { %v198_v21 = vadd.f32 %v197_v20, %v183_v19 }
 0x22b   :  { %200 = vst.msk [vmem:[#allocation2] sm:$0x1] %vm86_vm6, %v198_v21  ;;  %s267_s27 = spop %266 }
 0x22c   :  { %v218_v23 = vstv %s267_s27 }
 0x22d   :  { %297 = shalt.err (!%p294_p4)
}
 0x22e   :  { %230 = dma.vmem_to_hbm [thread:$0]  %s228_s23, 16, %s415_s3, [#allocation3]   ;;  %v219_v24 = vadd.f32 %v218_v23, %v201_v22 }
 0x22f   :  { %s306_s6 = scalar_lea.vmem %s238_s26, 16  ;;  %s310_s7 = scalar_lea.vmem %s238_s26, 32 }
 0x230   :  { %220 = vst.msk [vmem:[#allocation4] sm:$0x1] %vm86_vm6, %v219_v24  ;;  %p307_p5 = scmp.ne.s32.totalorder %s238_s26, %s306_s6  ;;  %p311_p6 = scmp.lt.s32.totalorder %s238_s26, %s238_s26 }
 0x231   :  { %p312_p7 = scmp.lt.s32.totalorder %s310_s7, %s306_s6 }
 0x233   :  { %p313_p8 = por %p312_p7, %p311_p6 }
 0x235   :  { %p314_p9 = pnand %p313_p8, %p307_p5 }
 0x237   :  { %317 = shalt.err (!%p314_p9)
}
 0x238   :  { %240 = dma.vmem_to_hbm [thread:$0]  %s238_s26, 16, %s416_s4, [#allocation5]  }
 0x239   :  { %326 = dma.done.wait [#allocation3], 16  }
 0x23a   :  { %327 = vsyncadd [#allocation3], 4294967280 }
 0x23b   :  { %328 = dma.done.wait [#allocation5], 16  }
 0x23c   :  { %329 = vsyncadd [#allocation5], 4294967280 }
 0x23d   :  { %247 = vsyncpa [#allocation3], 1 }
 0x23e   :  { %248 = vsyncpa [#allocation5], 1 }

</bundles_post_ra>
